<compile_context>
chip_gen: v7x
topology: tpu7x:2x2x1
jax: 0.10.0
libtpu: 0.0.40
codegen_flags: <defaults>
</compile_context>

<pallas_src>
import numpy as np
import jax
import jax.numpy as jnp
from jax import lax
from jax.experimental import pallas as pl
from jax.experimental.pallas import tpu as pltpu

F32 = jnp.float32
_TILE = 512                      # max flat output rows per grid step


def _round_up(x, m):
    return (x + m - 1) // m * m


# ------------------------------------------------------------------
# Shared flat-row geometry for one resolution (N, H, W).
#
# Buffer row  lead + (b*Hp + i)*Wp + j  holds pixel (i-1, j-1) of image b in
# padded coordinates (i in [0,Hp), j in [0,Wp)); pad positions, the zero head
# [0, lead) and the zero tail [lead+M, Btot) are all exactly zero, so a 3x3
# window for output row p is just the 9 rows  p - (Wp+1) + a*Wp + c.
# Tiles whose reads would leave the buffer contain only junk rows (guaranteed
# by the head/tail sizing) and are clamped + masked to zero.
# ------------------------------------------------------------------
def _geometry(N, H, W):
    Hp, Wp = H + 2, W + 2
    M = N * Hp * Wp
    T = min(_TILE, max(8, _round_up(-(-M // 2), 8)))   # >=2 work tiles (megacore)
    halo = _round_up(2 * Wp + 2, 8)                    # max forward tap offset
    lead = _round_up(Wp + 1, T)                        # zero head: read base stays >= 0
    Btot = _round_up(lead + M + halo, T) + T           # zero tail: clamped tiles are junk
    return dict(N=N, H=H, W=W, Hp=Hp, Wp=Wp, M=M, T=T, halo=halo, lead=lead,
                Btot=Btot, n_tiles=Btot // T, rb_max=Btot - T - halo)


def _valid_mask(g):
    """(Btot, 1) f32: 1.0 exactly at data rows (padded (i,j), 1<=i<=H, 1<=j<=W)."""
    m = np.zeros((g["Btot"], 1), np.float32)
    body = np.zeros((g["N"], g["Hp"], g["Wp"]), np.float32)
    body[:, 1:g["H"] + 1, 1:g["W"] + 1] = 1.0
    m[g["lead"]:g["lead"] + g["M"], 0] = body.reshape(-1)
    return jnp.asarray(m)


def _flatten_into(x_nhwc, g):
    """(N,H,W,C) -> per-image zero pad 1, flatten, place at rows [lead, lead+M)."""
    N, H, W, C = x_nhwc.shape
    xp = jnp.pad(x_nhwc, ((0, 0), (1, 1), (1, 1), (0, 0)))
    flat = xp.reshape(N * (H + 2) * (W + 2), C)
    return jnp.pad(flat, ((g["lead"], g["Btot"] - g["lead"] - flat.shape[0]), (0, 0)))


def _vmem_limit(g, cin, cout):
    need = 2 * g["Btot"] * cin * 4 + 4 * g["T"] * cout * 4 + (8 << 20)
    return int(min(max(need, 32 << 20), 100 << 20))


def _compiler_params(g, cin, cout):
    return pltpu.CompilerParams(dimension_semantics=("parallel",),
                                vmem_limit_bytes=_vmem_limit(g, cin, cout))


# ------------------------------------------------------------------
# Pallas kernels
# ------------------------------------------------------------------
def _load_taps(x_ref, rb, T, Wp, relu):
    """Lane-concatenated 3x3 neighbourhood: (T, 9*Cin).

    Each tap is a direct dynamic-row load from the resident ref (no window
    copy + re-slice chain); optional ReLU per tap (pad rows are zero)."""
    taps = []
    for a in range(3):
        for c in range(3):
            v = x_ref[pl.ds(rb + a * Wp + c, T), :]
            if relu:
                v = jnp.maximum(v, 0.0)
            taps.append(v)
    return jnp.concatenate(taps, axis=-1)


def _make_conv3x3_kernel(T, Wp, rb_max, relu_in):
    """3x3 stride-1 pad-1 conv as ONE (T, 9*Cin) x (9*Cin, Cout) matmul."""
    def kernel(x_ref, w_ref, b_ref, m_ref, o_ref):
        base = pl.program_id(0) * T
        rb = jnp.clip(base - (Wp + 1), 0, rb_max)       # junk tiles stay in-bounds
        lhs = _load_taps(x_ref, rb, T, Wp, relu_in)
        acc = jnp.dot(lhs, w_ref[...], preferred_element_type=F32) + b_ref[...]
        o_ref[...] = (acc * m_ref[...]).astype(o_ref.dtype)   # re-zero pad rows
    return kernel


def _make_resblock_kernel(T, Wp, rb_max):
    """Fused ResBlock: ReLU -> 3x3 -> ReLU -> 1x1 -> + x (intermediate in vregs)."""
    def kernel(x_ref, w1_ref, b1_ref, w2_ref, b2_ref, m_ref, o_ref):
        base = pl.multiple_of(pl.program_id(0) * T, 8)
        rb = jnp.clip(base - (Wp + 1), 0, rb_max)
        lhs = _load_taps(x_ref, rb, T, Wp, True)         # ReLU(x) taps
        h = jnp.maximum(jnp.dot(lhs, w1_ref[...], preferred_element_type=F32)
                        + b1_ref[...], 0.0)
        out = jnp.dot(h, w2_ref[...], preferred_element_type=F32) + b2_ref[...]
        out = out + x_ref[pl.ds(base, T), :]             # residual: raw x, row-aligned
        o_ref[...] = (out * m_ref[...]).astype(o_ref.dtype)
    return kernel


def _make_upconv_kernel(T, Wp, rb_max, relu_in, relu_out, fuse_ln):
    """ConvTranspose2d(k=4, s=2, p=1) via sub-pixel phases packed in the RHS.

    One matmul produces all 4 phases as a single (T, 4*Cout) accumulator;
    optional fused ReLU and per-phase channel LayerNorm (eps=1e-6) epilogue."""
    def body(x_ref, w_ref, b_ref, o_ref, avg_ref, g_ref, beta_ref):
        base = pl.multiple_of(pl.program_id(0) * T, 8)
        rb = jnp.minimum(base, rb_max)                   # tail junk tiles stay in-bounds
        lhs = _load_taps(x_ref, rb, T, Wp, relu_in)
        acc = jnp.dot(lhs, w_ref[...], preferred_element_type=F32) + b_ref[...]
        if relu_out:
            acc = jnp.maximum(acc, 0.0)
        if fuse_ln:
            # per-phase channel LayerNorm via block-diagonal averaging matmul
            mean = jnp.dot(acc, avg_ref[...], preferred_element_type=F32)
            xc = acc - mean
            var = jnp.dot(xc * xc, avg_ref[...], preferred_element_type=F32)
            acc = xc * lax.rsqrt(var + 1e-6) * g_ref[...] + beta_ref[...]
        o_ref[...] = acc.astype(o_ref.dtype)

    if fuse_ln:
        def kernel(x_ref, w_ref, b_ref, avg_ref, g_ref, beta_ref, o_ref):
            body(x_ref, w_ref, b_ref, o_ref, avg_ref, g_ref, beta_ref)
    else:
        def kernel(x_ref, w_ref, b_ref, o_ref):
            body(x_ref, w_ref, b_ref, o_ref, None, None, None)
    return kernel


# ------------------------------------------------------------------
# Layer wrappers (operate on the shared flat buffer; compute is in-kernel)
# ------------------------------------------------------------------
def conv3x3_flat(buf, mask, g, w, b, relu_in=False):
    Cin = buf.shape[-1]
    Cout = w.shape[-1]
    return pl.pallas_call(
        _make_conv3x3_kernel(g["T"], g["Wp"], g["rb_max"], relu_in),
        out_shape=jax.ShapeDtypeStruct((g["Btot"], Cout), buf.dtype),
        grid=(g["n_tiles"],),
        in_specs=[
            pl.BlockSpec((g["Btot"], Cin), lambda t: (0, 0)),     # resident input
            pl.BlockSpec((9 * Cin, Cout), lambda t: (0, 0)),
            pl.BlockSpec((1, Cout), lambda t: (0, 0)),
            pl.BlockSpec((g["T"], 1), lambda t: (t, 0)),
        ],
        out_specs=pl.BlockSpec((g["T"], Cout), lambda t: (t, 0)),
        compiler_params=_compiler_params(g, Cin, Cout),
    )(buf, w.reshape(9 * Cin, Cout), b.reshape(1, Cout), mask)


def resblock_flat(buf, mask, g, w1, b1, w2, b2):
    C = buf.shape[-1]
    R = w1.shape[-1]
    return pl.pallas_call(
        _make_resblock_kernel(g["T"], g["Wp"], g["rb_max"]),
        out_shape=jax.ShapeDtypeStruct((g["Btot"], C), buf.dtype),
        grid=(g["n_tiles"],),
        in_specs=[
            pl.BlockSpec((g["Btot"], C), lambda t: (0, 0)),
            pl.BlockSpec((9 * C, R), lambda t: (0, 0)),
            pl.BlockSpec((1, R), lambda t: (0, 0)),
            pl.BlockSpec((R, C), lambda t: (0, 0)),
            pl.BlockSpec((1, C), lambda t: (0, 0)),
            pl.BlockSpec((g["T"], 1), lambda t: (t, 0)),
        ],
        out_specs=pl.BlockSpec((g["T"], C), lambda t: (t, 0)),
        compiler_params=_compiler_params(g, C, C),
    )(buf, w1.reshape(9 * C, R), b1.reshape(1, R), w2, b2.reshape(1, C), mask)


def conv_transpose4x4_s2_flat(buf, g, wt, b, *, relu_in=False, relu_out=False,
                              ln_gamma=None, ln_beta=None):
    """nn.ConvTranspose2d(k=4, stride=2, padding=1), wt: (4,4,Cin,Cout)."""
    Cin = buf.shape[-1]
    Cout = wt.shape[-1]

    # pack the 4 sub-pixel 2x2 phase kernels into ONE zero-padded (9*Cin, 4*Cout)
    # RHS so all phases come out of a single matmul / single accumulator.
    wp = jnp.zeros((9, Cin, 4, Cout), wt.dtype)
    for r in range(2):
        for s in range(2):
            for di in range(2):
                for dj in range(2):
                    a, c = r + di, s + dj
                    kh = (3 if r == 0 else 2) - 2 * di
                    kw = (3 if s == 0 else 2) - 2 * dj
                    wp = wp.at[a * 3 + c, :, r * 2 + s, :].set(wt[kh, kw])
    wpk = wp.reshape(9 * Cin, 4 * Cout)
    bias4 = jnp.tile(b, 4).reshape(1, 4 * Cout)

    fuse_ln = ln_gamma is not None
    in_specs = [
        pl.BlockSpec((g["Btot"], Cin), lambda t: (0, 0)),
        pl.BlockSpec((9 * Cin, 4 * Cout), lambda t: (0, 0)),
        pl.BlockSpec((1, 4 * Cout), lambda t: (0, 0)),
    ]
    args = [buf, wpk, bias4]
    if fuse_ln:
        avg = jnp.asarray(np.kron(np.eye(4, dtype=np.float32),
                                  np.full((Cout, Cout), 1.0 / Cout, np.float32)))
        in_specs += [pl.BlockSpec((4 * Cout, 4 * Cout), lambda t: (0, 0)),
                     pl.BlockSpec((1, 4 * Cout), lambda t: (0, 0)),
                     pl.BlockSpec((1, 4 * Cout), lambda t: (0, 0))]
        args += [avg,
                 jnp.tile(ln_gamma, 4).reshape(1, 4 * Cout),
                 jnp.tile(ln_beta, 4).reshape(1, 4 * Cout)]

    out = pl.pallas_call(
        _make_upconv_kernel(g["T"], g["Wp"], g["rb_max"], relu_in, relu_out, fuse_ln),
        out_shape=jax.ShapeDtypeStruct((g["Btot"], 4 * Cout), buf.dtype),
        grid=(g["n_tiles"],),
        in_specs=in_specs,
        out_specs=pl.BlockSpec((g["T"], 4 * Cout), lambda t: (t, 0)),
        compiler_params=_compiler_params(g, Cin, 4 * Cout),
    )(*args)

    # interleave the 4 sub-pixel phases: flat rows -> (N, 2H, 2W, Cout)
    N, H, W, Hp, Wp = g["N"], g["H"], g["W"], g["Hp"], g["Wp"]
    o = out[g["lead"]:g["lead"] + g["M"]].reshape(N, Hp, Wp, 2, 2, Cout)[:, :H, :W]
    o = jnp.transpose(o, (0, 1, 3, 2, 4, 5)).reshape(N, 2 * H, 2 * W, Cout)
    return o


# ------------------------------------------------------------------
# Decoder parameters + forward
# ------------------------------------------------------------------
def init_decoder_params(key, in_channel, out_channel, channel,
                        n_res_block, n_res_channel, stride):
    keys = [key]

    def nxt():
        keys[0], sub = jax.random.split(keys[0])
        return sub

    def conv_w(k, cin, cout):
        scale = 1.0 / np.sqrt(cin * k * k)
        w = jax.random.uniform(nxt(), (k, k, cin, cout), F32, -scale, scale)
        b = jax.random.uniform(nxt(), (cout,), F32, -scale, scale)
        return w, b

    params = {"conv_in": conv_w(3, in_channel, channel), "res": []}
    for _ in range(n_res_block):
        params["res"].append((conv_w(3, channel, n_res_channel),
                              conv_w(1, n_res_channel, channel)))
    if stride == 4:
        params["up1"] = conv_w(4, channel, channel // 2)   # transpose-conv kernels
        params["up2"] = conv_w(4, channel // 2, out_channel)
    elif stride == 2:
        params["up1"] = conv_w(4, channel, out_channel)
    params["ln_gamma"] = jnp.ones((out_channel,), F32)     # nn.LayerNorm defaults
    params["ln_beta"] = jnp.zeros((out_channel,), F32)
    return params


def decoder_forward(params, x_nchw, stride):
    x = jnp.transpose(x_nchw, (0, 2, 3, 1)).astype(F32)    # NCHW -> NHWC
    N, H, W, _ = x.shape
    g1 = _geometry(N, H, W)
    mask1 = _valid_mask(g1)
    buf = _flatten_into(x, g1)

    w, b = params["conv_in"]
    buf = conv3x3_flat(buf, mask1, g1, w, b)
    for (w1, b1), (w2, b2) in params["res"]:
        buf = resblock_flat(buf, mask1, g1, w1, b1, w2[0, 0], b2)

    # trailing ReLU is fused as relu_in of the first transposed conv
    if stride == 4:
        y = conv_transpose4x4_s2_flat(buf, g1, *params["up1"],
                                      relu_in=True, relu_out=True)
        g2 = _geometry(N, 2 * H, 2 * W)
        buf2 = _flatten_into(y, g2)
        y = conv_transpose4x4_s2_flat(buf2, g2, *params["up2"],
                                      ln_gamma=params["ln_gamma"],
                                      ln_beta=params["ln_beta"])
    else:  # stride == 2
        y = conv_transpose4x4_s2_flat(buf, g1, *params["up1"], relu_in=True,
                                      ln_gamma=params["ln_gamma"],
                                      ln_beta=params["ln_beta"])
    return jnp.transpose(y, (0, 3, 1, 2))                  # NHWC -> NCHW


# ------------------------------------------------------------------
# Pure-JAX reference (XLA convs) for correctness check
# ------------------------------------------------------------------
def ref_decoder(params, x_nchw, stride):
    x = jnp.transpose(x_nchw, (0, 2, 3, 1))

    def conv(x, w, b, pad):
        y = lax.conv_general_dilated(
            x, w, (1, 1), ((pad, pad), (pad, pad)),
            dimension_numbers=("NHWC", "HWIO", "NHWC"))
        return y + b

    def convT(x, wt, b):
        wc = wt[::-1, ::-1, :, :]          # ConvTranspose = dilate + flipped conv
        y = lax.conv_general_dilated(
            x, wc, (1, 1), ((2, 2), (2, 2)), lhs_dilation=(2, 2),
            dimension_numbers=("NHWC", "HWIO", "NHWC"))
        return y + b

    w, b = params["conv_in"]
    x = conv(x, w, b, 1)
    for (w1, b1), (w2, b2) in params["res"]:
        h = jax.nn.relu(conv(jax.nn.relu(x), w1, b1, 1))
        x = conv(h, w2, b2, 0) + x
    x = jax.nn.relu(x)
    if stride == 4:
        x = jax.nn.relu(convT(x, *params["up1"]))
        x = convT(x, *params["up2"])
    else:
        x = convT(x, *params["up1"])
    mean = jnp.mean(x, axis=-1, keepdims=True)
    var = jnp.mean((x - mean) ** 2, axis=-1, keepdims=True)
    x = (x - mean) / jnp.sqrt(var + 1e-6) * params["ln_gamma"] + params["ln_beta"]
    return jnp.transpose(x, (0, 3, 1, 2))


# ------------------------------------------------------------------
if __name__ == "__main__":
    # Decoder(in_channel=4, out_channel=3, channel=32,
    #         n_res_block=2, n_res_channel=8, stride=4)
    in_channel, out_channel, channel = 4, 3, 32
    n_res_block, n_res_channel, stride = 2, 8, 4
    N, H, W = 2, 8, 8

    key = jax.random.PRNGKey(0)
    k_x, k_p = jax.random.split(key)
    x = jax.random.normal(k_x, (N, in_channel, H, W), F32)          # NCHW
    params = init_decoder_params(k_p, in_channel, out_channel, channel,
                                 n_res_block, n_res_channel, stride)

    out = jax.block_until_ready(decoder_forward(params, x, stride))
    assert out.shape == (N, out_channel, H * 4, W * 4), out.shape

    ref = jax.block_until_ready(ref_decoder(params, x, stride))
    np.testing.assert_allclose(np.asarray(out), np.asarray(ref),
                               rtol=2e-4, atol=2e-4)
    print("KERNEL_OK")
</pallas_src>

<mosaic_0001>
module attributes {stable_mosaic.version = 11 : i64} {
  func.func @kernel(%arg0: i32, %arg1: memref<520x4xf32, #tpu.memory_space<vmem>>, %arg2: memref<36x32xf32, #tpu.memory_space<vmem>>, %arg3: memref<1x32xf32, #tpu.memory_space<vmem>>, %arg4: memref<104x1xf32, #tpu.memory_space<vmem>>, %arg5: memref<104x32xf32, #tpu.memory_space<vmem>>) attributes {dimension_semantics = [#tpu.dimension_semantics<parallel>], iteration_bounds = array<i64: 5>, scalar_prefetch = 0 : i64, scratch_operands = 0 : i64, tpu.core_type = #tpu.core_type<tc>, window_params = [{pipeline_mode = #tpu.pipeline_mode<synchronous>, transform_indices = @transform_0, window_bounds = array<i64: 520, 4>}, {pipeline_mode = #tpu.pipeline_mode<synchronous>, transform_indices = @transform_1, window_bounds = array<i64: 36, 32>}, {pipeline_mode = #tpu.pipeline_mode<synchronous>, transform_indices = @transform_2, window_bounds = array<i64: 1, 32>}, {transform_indices = @transform_3, window_bounds = array<i64: 104, 1>}, {transform_indices = @transform_4, window_bounds = array<i64: 104, 32>}]} {
    %c104_i32 = arith.constant 104 : i32
    %0 = arith.muli %arg0, %c104_i32 : i32
    %c11_i32 = arith.constant 11 : i32
    %1 = arith.subi %0, %c11_i32 : i32
    %c0_i32 = arith.constant 0 : i32
    %c392_i32 = arith.constant 392 : i32
    %2 = arith.maxsi %c0_i32, %1 : i32
    %3 = arith.minsi %c392_i32, %2 : i32
    %c0_i32_0 = arith.constant 0 : i32
    %4 = arith.addi %3, %c0_i32_0 : i32
    %c0_i32_1 = arith.constant 0 : i32
    %5 = arith.addi %4, %c0_i32_1 : i32
    %6 = arith.index_cast %5 : i32 to index
    %c0 = arith.constant 0 : index
    %7 = vector.load %arg1[%6, %c0] : memref<520x4xf32, #tpu.memory_space<vmem>>, vector<104x4xf32>
    %c0_i32_2 = arith.constant 0 : i32
    %8 = arith.addi %3, %c0_i32_2 : i32
    %c1_i32 = arith.constant 1 : i32
    %9 = arith.addi %8, %c1_i32 : i32
    %10 = arith.index_cast %9 : i32 to index
    %c0_3 = arith.constant 0 : index
    %11 = vector.load %arg1[%10, %c0_3] : memref<520x4xf32, #tpu.memory_space<vmem>>, vector<104x4xf32>
    %c0_i32_4 = arith.constant 0 : i32
    %12 = arith.addi %3, %c0_i32_4 : i32
    %c2_i32 = arith.constant 2 : i32
    %13 = arith.addi %12, %c2_i32 : i32
    %14 = arith.index_cast %13 : i32 to index
    %c0_5 = arith.constant 0 : index
    %15 = vector.load %arg1[%14, %c0_5] : memref<520x4xf32, #tpu.memory_space<vmem>>, vector<104x4xf32>
    %c10_i32 = arith.constant 10 : i32
    %16 = arith.addi %3, %c10_i32 : i32
    %c0_i32_6 = arith.constant 0 : i32
    %17 = arith.addi %16, %c0_i32_6 : i32
    %18 = arith.index_cast %17 : i32 to index
    %c0_7 = arith.constant 0 : index
    %19 = vector.load %arg1[%18, %c0_7] : memref<520x4xf32, #tpu.memory_space<vmem>>, vector<104x4xf32>
    %c10_i32_8 = arith.constant 10 : i32
    %20 = arith.addi %3, %c10_i32_8 : i32
    %c1_i32_9 = arith.constant 1 : i32
    %21 = arith.addi %20, %c1_i32_9 : i32
    %22 = arith.index_cast %21 : i32 to index
    %c0_10 = arith.constant 0 : index
    %23 = vector.load %arg1[%22, %c0_10] : memref<520x4xf32, #tpu.memory_space<vmem>>, vector<104x4xf32>
    %c10_i32_11 = arith.constant 10 : i32
    %24 = arith.addi %3, %c10_i32_11 : i32
    %c2_i32_12 = arith.constant 2 : i32
    %25 = arith.addi %24, %c2_i32_12 : i32
    %26 = arith.index_cast %25 : i32 to index
    %c0_13 = arith.constant 0 : index
    %27 = vector.load %arg1[%26, %c0_13] : memref<520x4xf32, #tpu.memory_space<vmem>>, vector<104x4xf32>
    %c20_i32 = arith.constant 20 : i32
    %28 = arith.addi %3, %c20_i32 : i32
    %c0_i32_14 = arith.constant 0 : i32
    %29 = arith.addi %28, %c0_i32_14 : i32
    %30 = arith.index_cast %29 : i32 to index
    %c0_15 = arith.constant 0 : index
    %31 = vector.load %arg1[%30, %c0_15] : memref<520x4xf32, #tpu.memory_space<vmem>>, vector<104x4xf32>
    %c20_i32_16 = arith.constant 20 : i32
    %32 = arith.addi %3, %c20_i32_16 : i32
    %c1_i32_17 = arith.constant 1 : i32
    %33 = arith.addi %32, %c1_i32_17 : i32
    %34 = arith.index_cast %33 : i32 to index
    %c0_18 = arith.constant 0 : index
    %35 = vector.load %arg1[%34, %c0_18] : memref<520x4xf32, #tpu.memory_space<vmem>>, vector<104x4xf32>
    %c20_i32_19 = arith.constant 20 : i32
    %36 = arith.addi %3, %c20_i32_19 : i32
    %c2_i32_20 = arith.constant 2 : i32
    %37 = arith.addi %36, %c2_i32_20 : i32
    %38 = arith.index_cast %37 : i32 to index
    %c0_21 = arith.constant 0 : index
    %39 = vector.load %arg1[%38, %c0_21] : memref<520x4xf32, #tpu.memory_space<vmem>>, vector<104x4xf32>
    %40 = tpu.concatenate %7, %11, %15, %19, %23, %27, %31, %35, %39 in 1 : vector<104x4xf32>, vector<104x4xf32>, vector<104x4xf32>, vector<104x4xf32>, vector<104x4xf32>, vector<104x4xf32>, vector<104x4xf32>, vector<104x4xf32>, vector<104x4xf32> -> vector<104x36xf32>
    %c0_22 = arith.constant 0 : index
    %c0_23 = arith.constant 0 : index
    %41 = vector.load %arg2[%c0_22, %c0_23] : memref<36x32xf32, #tpu.memory_space<vmem>>, vector<36x32xf32>
    %cst = arith.constant dense<0.000000e+00> : vector<104x32xf32>
    %42 = tpu.matmul %40, %41, %cst {dimension_numbers = #tpu.dot_dimension_numbers<[1], [0], [0], [1], [0, 0, 1, 1], [], []>} : vector<104x36xf32>, vector<36x32xf32>, vector<104x32xf32> -> vector<104x32xf32>
    %c0_24 = arith.constant 0 : index
    %c0_25 = arith.constant 0 : index
    %43 = vector.load %arg3[%c0_24, %c0_25] : memref<1x32xf32, #tpu.memory_space<vmem>>, vector<1x32xf32>
    %44 = vector.broadcast %43 : vector<1x32xf32> to vector<104x32xf32>
    %45 = arith.addf %42, %44 : vector<104x32xf32>
    %c0_26 = arith.constant 0 : index
    %c0_27 = arith.constant 0 : index
    %46 = vector.load %arg4[%c0_26, %c0_27] : memref<104x1xf32, #tpu.memory_space<vmem>>, vector<104x1xf32>
    %47 = vector.broadcast %46 : vector<104x1xf32> to vector<104x32xf32>
    %48 = arith.mulf %45, %47 : vector<104x32xf32>
    %c0_28 = arith.constant 0 : index
    %c0_29 = arith.constant 0 : index
    %49 = vector.load %arg5[%c0_28, %c0_29] : memref<104x32xf32, #tpu.memory_space<vmem>>, vector<104x32xf32>
    tpu.vector_store %arg5[%c0_28, %c0_29], %48 {strides = array<i32>} : memref<104x32xf32, #tpu.memory_space<vmem>>, vector<104x32xf32>,
    return
  }
  func.func @transform_0(%arg0: i32) -> (i32, i32) {
    %c0_i32 = arith.constant 0 : i32
    %c0_i32_0 = arith.constant 0 : i32
    %c0_i32_1 = arith.constant 0 : i32
    return %c0_i32, %c0_i32_0 : i32, i32
  }
  func.func @transform_1(%arg0: i32) -> (i32, i32) {
    %c0_i32 = arith.constant 0 : i32
    %c0_i32_0 = arith.constant 0 : i32
    %c0_i32_1 = arith.constant 0 : i32
    return %c0_i32, %c0_i32_0 : i32, i32
  }
  func.func @transform_2(%arg0: i32) -> (i32, i32) {
    %c0_i32 = arith.constant 0 : i32
    %c0_i32_0 = arith.constant 0 : i32
    %c0_i32_1 = arith.constant 0 : i32
    return %c0_i32, %c0_i32_0 : i32, i32
  }
  func.func @transform_3(%arg0: i32) -> (i32, i32) {
    %c0_i32 = arith.constant 0 : i32
    %c0_i32_0 = arith.constant 0 : i32
    return %arg0, %c0_i32 : i32, i32
  }
  func.func @transform_4(%arg0: i32) -> (i32, i32) {
    %c0_i32 = arith.constant 0 : i32
    %c0_i32_0 = arith.constant 0 : i32
    return %arg0, %c0_i32 : i32, i32
  }
}

</mosaic_0001>

<bundles_post_ra>
// kernel: tpu_custom_call.1
= control target key start
LH: loop header
LB: loop body
LE: loop exit
PB: predicated region body
PF: predicated region fallthrough
CT: control target
= control target key end

     0   :  { %s1514_s15 = smov 0   ;;  %s2054_s0 = inlined_call_operand.vmem [shape: f32[520,4], index: 0, kind: input, shape index: {}]   ;;  %s2055_s1 = inlined_call_operand.vmem [shape: f32[36,32], index: 1, kind: input, shape index: {}]   ;;  %s2056_s2 = inlined_call_operand.vmem [shape: f32[1,32], index: 2, kind: input, shape index: {}]   ;;  %s2057_s3 = inlined_call_operand.vmem [shape: f32[520,1], index: 3, kind: input, shape index: {}]   ;;  %s2058_s4 = inlined_call_operand.vmem [shape: f32[520,32], index: 4, kind: output, shape index: {}]  }
   0x1 LB: > { %s1232_s16 = sadd.s32 4294967295, %s1475_s15   ;;  %p1236_p0 = scmp.ge.s32.totalorder %s1475_s15, 1  ;;  %s1475_s15 = sphi %s1514_s15, %s14_s15  }
   0x2   : > { %p163_p1 = scmp.lt.s32.totalorder %s1475_s15, 6 }
   0x4   : > { %p164_p2 = pnand %p1236_p0, %p163_p1 }
   0x5   : > { %s201_s17 = smul.u32 (!%p164_p2), 104, %s1232_s16  ;;  %s1477_s22 = smov (!%p164_p2), 12   ;;  %v1481_v6 = vmov (!%p164_p2), 0.0|0.0   ;;  %vm1483_vm0 = vmmov (!%p164_p2), 0   ;;  %v1484_v10 = vmov (!%p164_p2), 0.0   ;;  %v869_v13 = vld [vmem:[%s2055_s1] sm:$0xff] (!%p164_p2) }
   0x6   : > { %167 = sbr.rel (%p164_p2) target bundleno = 554 (0x22a), region = 36  ;;  %s1478_s23 = smov (!%p164_p2), 4   ;;  %1435 = vmatprep.subr.bf16.mxu0 (!%p164_p2), %v1481_v6  ;;  %1441 = vmatprep.subr.bf16.mxu1 (!%p164_p2), %v1481_v6  ;;  %v870_v14 = vld [vmem:[%s2055_s1 + $0x8] sm:$0xff] (!%p164_p2)  ;;  %v871_v15 = vld [vmem:[%s2055_s1 + $0x10] sm:$0xff] (!%p164_p2)  ;;  %v872_v19 = vld [vmem:[%s2055_s1 + $0x18] sm:$0xff] (!%p164_p2)  ;;  %vm921_vm1 = vcmask (!%p164_p2), 1043456  }
   0x7   : > { %s1239_s18 = sadd.s32 (!%p164_p2), 4294967285, %s201_s17  ;;  %s1479_s24 = smov (!%p164_p2), 16   ;;  %1396 = vmatprep.mubr.msk.f32.mxu0 (!%p164_p2), %vm1483_vm0, %v1484_v10  ;;  %1417 = vmatprep.mubr.msk.f32.mxu1 (!%p164_p2), %vm1483_vm0, %v1484_v10  ;;  %v1436_v18 = vpack.c.bf16 (!%p164_p2), %v870_v14, %v869_v13  ;;  %v1439_v20 = vpack.c.bf16 (!%p164_p2), %v872_v19, %v871_v15  ;;  %v873_v23 = vld [vmem:[%s2055_s1 + $0x20] sm:$0xf] (!%p164_p2)  ;;  %v1488_v51 = vmov (!%p164_p2), 0   ;;  %vm757_vm2 = vcmask (!%p164_p2), 31744  }
   0x8   : > { %p203_p3 = scmp.gt.s32.totalorder (!%p164_p2), %s1239_s18, 0  ;;  %p1240_p4 = scmp.lt.s32.totalorder (!%p164_p2), %s1239_s18, 392  ;;  %1467 = vset.pattern.permute.xlu0 (!%p164_p2), %v1488_v51  ;;  %1468 = vset.pattern.permute.xlu1 (!%p164_p2), %v1488_v51  ;;  %vm771_vm3 = vcmask (!%p164_p2), 64512   ;;  %vm785_vm4 = vcmask (!%p164_p2), 97280   ;;  %vm799_vm5 = vcmask (!%p164_p2), 130048   ;;  %vm813_vm6 = vcmask (!%p164_p2), 162816  }
   0x9   : > { %s1480_s25 = smov (!%p164_p2), 8   ;;  %s1482_s26 = smov (!%p164_p2), 20   ;;  %1437 = vmatpush3.bf16.msra.mxu0 (!%p164_p2), %v1436_v18  ;;  %1444 = vmatpush3.bf16.msra.mxu1 (!%p164_p2), %v1436_v18  ;;  %vm827_vm7 = vcmask (!%p164_p2), 195584   ;;  %vm841_vm8 = vcmask (!%p164_p2), 228352   ;;  %vm855_vm9 = vcmask (!%p164_p2), 261120   ;;  %vm881_vm10 = vcmask (!%p164_p2), 293888  }
   0xa   : > { %s1485_s27 = smov (!%p164_p2), 24   ;;  %s1486_s10 = smov (!%p164_p2), 28   ;;  %1438 = vmatprep.subr.bf16.mxu0 (!%p164_p2), %v1481_v6  ;;  %1442 = vmatprep.subr.bf16.mxu1 (!%p164_p2), %v1481_v6 }
   0xb   : > { %s1487_s11 = smov (!%p164_p2), 32   ;;  %s189_s14 = smul.u32 (!%p164_p2), 13, %s1232_s16 }
   0xd   : > { %s2060_s18 = smov (!%p203_p3, %s1239_s18), 0  ;;  %1440 = vmatpush3.bf16.msra.mxu0 %v1439_v20  ;;  %1445 = vmatpush3.bf16.msra.mxu1 %v1439_v20  ;;  %p190_p5 = scmp.lt.s32.totalorder %s189_s14, 64 }
   0xe   : > { %s2062_s18 = smov (!%p1240_p4, %s2060_s18), 392  ;;  %1394 = vmatprep.subr.mxu0 %v1484_v10  ;;  %1443 = vmatprep.subr.mxu1 %v1484_v10 }
   0xf   : > { %s1527_s21 = scalar_lea.vmem %s2054_s0, %s2062_s18  ;;  %s2064_s14 = smov (!%p190_p5, %s189_s14), 64 }
  0x10   : > { %v1271_v0 = vld [vmem:[%s1527_s21 + $0xa] sm:$0xff]  ;;  %v1245_v1 = vld [vmem:[%s1527_s21 + $0x1] sm:$0xff]  ;;  %v1252_v4 = vld [vmem:[%s1527_s21 + $0x39] sm:$0xff]  ;;  %s1237_s16 = sshll.u32 %s2064_s14, 3 }
  0x11   : > { %458 = vrot.lane.b32.xlu1 %v1271_v0, %s1477_s22  ;;  %354 = vrot.lane.b32.xlu0 %v1245_v1, %s1478_s23  ;;  %v1284_v2 = vld [vmem:[%s1527_s21 + $0xb] sm:$0xff]  ;;  %v1258_v3 = vld [vmem:[%s1527_s21 + $0x2] sm:$0xff]  ;;  %s1857_s19 = scalar_lea.vmem %s2057_s3, %s1237_s16 }
  0x12   : > { %v1246_v5 = vld [vmem:[%s1527_s21 + $0x9] sm:$0xff]  ;;  %v1310_v8 = vld [vmem:[%s1527_s21 + $0x14] sm:$0xff]  ;;  %v1253_v24 = vld [vmem:[%s1527_s21 + $0x41] sm:$0xff]  ;;  %1395 = vmatpush3.msk.msra.mxu0 %vm921_vm1, %v873_v23  ;;  %1446 = vmatpush3.msk.msra.mxu1 %vm921_vm1, %v873_v23 }
  0x13   : > { %v1297_v7 = vld [vmem:[%s1527_s21 + $0xc] sm:$0xff]  ;;  %v1546_v9 = vld [vmem:[%s1527_s21 + $0x3a] sm:$0xff]  ;;  %v1278_v11 = vld [vmem:[%s1527_s21 + $0x42] sm:$0xff] }
  0x14   : > { %v1272_v12 = vld [vmem:[%s1527_s21 + $0x12] sm:$0xff]  ;;  %v1291_v22 = vld [vmem:[%s1527_s21 + $0x43] sm:$0xff]  ;;  %v1273_v30 = vld [vmem:[%s1527_s21 + $0x1a] sm:$0xff] }
  0x15   : > { %510 = vrot.lane.b32.xlu1 %v1284_v2, %s1479_s24  ;;  %406 = vrot.lane.b32.xlu0 %v1258_v3, %s1480_s25  ;;  %v1285_v16 = vld [vmem:[%s1527_s21 + $0x13] sm:$0xff]  ;;  %v1589_v26 = vld [vmem:[%s1527_s21 + $0x44] sm:$0xff] }
  0x16   : > { %v1323_v17 = vld [vmem:[%s1527_s21 + $0x15] sm:$0xff]  ;;  %v1317_v27 = vld [vmem:[%s1527_s21 + $0x4c] sm:$0xff]  ;;  %v1324_v32 = vld [vmem:[%s1527_s21 + $0x1d] sm:$0xff] }
  0x17   : > { %v1336_v21 = vld [vmem:[%s1527_s21 + $0x16] sm:$0xff]  ;;  %v1279_v29 = vld [vmem:[%s1527_s21 + $0x4a] sm:$0xff]  ;;  %v1337_v36 = vld [vmem:[%s1527_s21 + $0x1e] sm:$0xff] }
  0x18   : > { %v1247_v25 = vld [vmem:[%s1527_s21 + $0x11] sm:$0xff]  ;;  %v1311_v28 = vld [vmem:[%s1527_s21 + $0x1c] sm:$0xff]  ;;  %v1254_v37 = vld [vmem:[%s1527_s21 + $0x49] sm:$0xff] }
  0x19   : > { %368 = vrot.lane.b32.xlu1 %v1252_v4, %s1478_s23  ;;  %356 = vrot.lane.b32.xlu0 %v1246_v5, %s1478_s23  ;;  %v1330_v31 = vld [vmem:[%s1527_s21 + $0x4d] sm:$0xff]  ;;  %v1286_v34 = vld [vmem:[%s1527_s21 + $0x1b] sm:$0xff] }
  0x1a   : > { %v1292_v33 = vld [vmem:[%s1527_s21 + $0x4b] sm:$0xff]  ;;  %v1248_v38 = vld [vmem:[%s1527_s21 + $0x19] sm:$0xff]  ;;  %v1274_v42 = vld [vmem:[%s1527_s21 + $0x22] sm:$0xff] }
  0x1b   : > { %v1343_v35 = vld [vmem:[%s1527_s21 + $0x4e] sm:$0xff]  ;;  %v1312_v40 = vld [vmem:[%s1527_s21 + $0x24] sm:$0xff]  ;;  %v1344_v47 = vld [vmem:[%s1527_s21 + $0x56] sm:$0xff] }
  0x1c   : > { %v1318_v39 = vld [vmem:[%s1527_s21 + $0x54] sm:$0xff]  ;;  %v1325_v44 = vld [vmem:[%s1527_s21 + $0x25] sm:$0xff]  ;;  %v1319_v52 = vld [vmem:[%s1527_s21 + $0x5c] sm:$0xff] }
  0x1d   : > { %408 = vrot.lane.b32.xlu1 %v1271_v0, %s1480_s25  ;;  %562 = vrot.lane.b32.xlu0 %v1297_v7, %s1482_s26  ;;  %v1280_v41 = vld [vmem:[%s1527_s21 + $0x52] sm:$0xff]  ;;  %v1287_v46 = vld [vmem:[%s1527_s21 + $0x23] sm:$0xff] }
  0x1e   : > { %v1331_v43 = vld [vmem:[%s1527_s21 + $0x55] sm:$0xff]  ;;  %v1338_v48 = vld [vmem:[%s1527_s21 + $0x26] sm:$0xff]  ;;  %v1332_v56 = vld [vmem:[%s1527_s21 + $0x5d] sm:$0xff] }
  0x1f   : > { %v1293_v45 = vld [vmem:[%s1527_s21 + $0x53] sm:$0xff]  ;;  %v1249_v50 = vld [vmem:[%s1527_s21 + $0x21] sm:$0xff]  ;;  %v1275_v55 = vld [vmem:[%s1527_s21 + $0x2a] sm:$0xff] }
  0x20   : > { %v1255_v49 = vld [vmem:[%s1527_s21 + $0x51] sm:$0xff]  ;;  %v1281_v54 = vld [vmem:[%s1527_s21 + $0x5a] sm:$0xff]  ;;  %v1250_v5 = vld [vmem:[%s1527_s21 + $0x29] sm:$0xff] }
  0x21   : > { %614 = vrot.lane.b32.xlu1 %v1310_v8, %s1485_s27  ;;  %420 = vrot.lane.b32.xlu0 %v1546_v9, %s1480_s25  ;;  %v1313_v53 = vld [vmem:[%s1527_s21 + $0x2c] sm:$0xff]  ;;  %v1294_v60 = vld [vmem:[%s1527_s21 + $0x5b] sm:$0xff] }
  0x22   : > { %v1326_v57 = vld [vmem:[%s1527_s21 + $0x2d] sm:$0xff]  ;;  %v1345_v0 = vld [vmem:[%s1527_s21 + $0x5e] sm:$0xff] }
  0x23   : > { %v1288_v61 = vld [vmem:[%s1527_s21 + $0x2b] sm:$0xff]  ;;  %v1256_v4 = vld [vmem:[%s1527_s21 + $0x59] sm:$0xff] }
  0x24   : > { %v1339_v1 = vld [vmem:[%s1527_s21 + $0x2e] sm:$0xff]  ;;  %v1320_v18 = vld [vmem:[%s1527_s21 + $0x64] sm:$0xff] }
  0x25   : > { %472 = vrot.lane.b32.xlu1 %v1278_v11, %s1477_s22  ;;  %460 = vrot.lane.b32.xlu0 %v1272_v12, %s1477_s22  ;;  %v1314_v19 = vld [vmem:[%s1527_s21 + $0x34] sm:$0xff]  ;;  %v209_v51 = vld [vmem:[%s1527_s21 + $0x8] sm:$0xff] }
  0x29   : > { %512 = vrot.lane.b32.xlu1 %v1285_v16, %s1479_s24  ;;  %666 = vrot.lane.b32.xlu0 %v1323_v17, %s1486_s10 }
  0x2d   : > { %718 = vrot.lane.b32.xlu1 %v1336_v21, %s1487_s11  ;;  %524 = vrot.lane.b32.xlu0 %v1291_v22, %s1479_s24 }
  0x31   : > { %370 = vrot.lane.b32.xlu1 %v1253_v24, %s1478_s23  ;;  %358 = vrot.lane.b32.xlu0 %v1247_v25, %s1478_s23  ;;  %v1282_v25 = vld [vmem:[%s1527_s21 + $0x62] sm:$0xff] }
  0x35   : > { %576 = vrot.lane.b32.xlu1 %v1589_v26, %s1482_s26  ;;  %564 = vrot.lane.b32.xlu0 %v1310_v8, %s1482_s26  ;;  %v208_v8 = vld [vmem:[%s1527_s21] sm:$0xff] }
  0x39   : > { %422 = vrot.lane.b32.xlu1 %v1278_v11, %s1480_s25  ;;  %410 = vrot.lane.b32.xlu0 %v1272_v12, %s1480_s25 }
  0x3d   : > { %628 = vrot.lane.b32.xlu1 %v1317_v27, %s1485_s27  ;;  %616 = vrot.lane.b32.xlu0 %v1311_v28, %s1485_s27 }
  0x41   : > { %474 = vrot.lane.b32.xlu1 %v1279_v29, %s1477_s22  ;;  %462 = vrot.lane.b32.xlu0 %v1273_v30, %s1477_s22 }
  0x45   : > { %680 = vrot.lane.b32.xlu1 %v1330_v31, %s1486_s10  ;;  %668 = vrot.lane.b32.xlu0 %v1324_v32, %s1486_s10  ;;  %v1333_v32 = vld [vmem:[%s1527_s21 + $0x65] sm:$0xff] }
  0x49   : > { %526 = vrot.lane.b32.xlu1 %v1292_v33, %s1479_s24  ;;  %514 = vrot.lane.b32.xlu0 %v1286_v34, %s1479_s24  ;;  %v1327_v33 = vld [vmem:[%s1527_s21 + $0x35] sm:$0xff] }
  0x4d   : > { %732 = vrot.lane.b32.xlu1 %v1343_v35, %s1487_s11  ;;  %720 = vrot.lane.b32.xlu0 %v1337_v36, %s1487_s11  ;;  %v1295_v36 = vld [vmem:[%s1527_s21 + $0x63] sm:$0xff] }
  0x51   : > { %372 = vrot.lane.b32.xlu1 %v1254_v37, %s1478_s23  ;;  %360 = vrot.lane.b32.xlu0 %v1248_v38, %s1478_s23  ;;  %v1289_v37 = vld [vmem:[%s1527_s21 + $0x33] sm:$0xff] }
  0x55   : > { %578 = vrot.lane.b32.xlu1 %v1317_v27, %s1482_s26  ;;  %566 = vrot.lane.b32.xlu0 %v1311_v28, %s1482_s26  ;;  %v1276_v27 = vld [vmem:[%s1527_s21 + $0x32] sm:$0xff] }
  0x59   : > { %424 = vrot.lane.b32.xlu1 %v1279_v29, %s1480_s25  ;;  %412 = vrot.lane.b32.xlu0 %v1273_v30, %s1480_s25 }
  0x5d   : > { %630 = vrot.lane.b32.xlu1 %v1318_v39, %s1485_s27  ;;  %618 = vrot.lane.b32.xlu0 %v1312_v40, %s1485_s27 }
  0x61   : > { %476 = vrot.lane.b32.xlu1 %v1280_v41, %s1477_s22  ;;  %464 = vrot.lane.b32.xlu0 %v1274_v42, %s1477_s22 }
  0x65   : > { %682 = vrot.lane.b32.xlu1 %v1331_v43, %s1486_s10  ;;  %670 = vrot.lane.b32.xlu0 %v1325_v44, %s1486_s10  ;;  %v1257_v44 = vld [vmem:[%s1527_s21 + $0x61] sm:$0xff] }
  0x69   : > { %528 = vrot.lane.b32.xlu1 %v1293_v45, %s1479_s24  ;;  %516 = vrot.lane.b32.xlu0 %v1287_v46, %s1479_s24  ;;  %v1251_v45 = vld [vmem:[%s1527_s21 + $0x31] sm:$0xff] }
  0x6d   : > { %734 = vrot.lane.b32.xlu1 %v1344_v47, %s1487_s11  ;;  %722 = vrot.lane.b32.xlu0 %v1338_v48, %s1487_s11 }
  0x71   : > { %374 = vrot.lane.b32.xlu1 %v1255_v49, %s1478_s23  ;;  %362 = vrot.lane.b32.xlu0 %v1249_v50, %s1478_s23  ;;  %v215_v50 = vld [vmem:[%s1527_s21 + $0x38] sm:$0xff] }
  0x75   : > { %580 = vrot.lane.b32.xlu1 %v1318_v39, %s1482_s26  ;;  %568 = vrot.lane.b32.xlu0 %v1312_v40, %s1482_s26  ;;  %v1346_v40 = vld [vmem:[%s1527_s21 + $0x66] sm:$0xff] }
  0x79   : > { %426 = vrot.lane.b32.xlu1 %v1280_v41, %s1480_s25  ;;  %414 = vrot.lane.b32.xlu0 %v1274_v42, %s1480_s25  ;;  %v1340_v41 = vld [vmem:[%s1527_s21 + $0x36] sm:$0xff] }
  0x7d   : > { %632 = vrot.lane.b32.xlu1 %v1319_v52, %s1485_s27  ;;  %620 = vrot.lane.b32.xlu0 %v1313_v53, %s1485_s27 }
  0x81   : > { %478 = vrot.lane.b32.xlu1 %v1281_v54, %s1477_s22  ;;  %466 = vrot.lane.b32.xlu0 %v1275_v55, %s1477_s22 }
  0x83   : > { %v459_v58 = vpop.permute.xlu1 %458  ;;  %v355_v59 = vpop.permute.xlu0 %354 }
  0x84   : > { %v758_v13 = vsel %vm757_vm2, %v208_v8, %v355_v59  ;;  %v1315_v59 = vld [vmem:[%s1527_s21 + $0x3c] sm:$0xff] }
  0x85   : > { %684 = vrot.lane.b32.xlu1 %v1332_v56, %s1486_s10  ;;  %672 = vrot.lane.b32.xlu0 %v1326_v57, %s1486_s10 }
  0x87   : > { %v511_v62 = vpop.permute.xlu1 %510  ;;  %v407_v63 = vpop.permute.xlu0 %406 }
  0x88   : > { %v772_v14 = vsel %vm771_vm3, %v758_v13, %v407_v63 }
  0x89   : > { %530 = vrot.lane.b32.xlu1 %v1294_v60, %s1479_s24  ;;  %518 = vrot.lane.b32.xlu0 %v1288_v61, %s1479_s24  ;;  %v786_v17 = vsel %vm785_vm4, %v772_v14, %v459_v58  ;;  %v1321_v58 = vld [vmem:[%s1527_s21 + $0x6c] sm:$0xff] }
  0x8a   : > { %v800_v22 = vsel %vm799_vm5, %v786_v17, %v511_v62 }
  0x8b   : > { %v1670_v2 = vpop.permute.xlu1 %368  ;;  %v1672_v3 = vpop.permute.xlu0 %356 }
  0x8d   : > { %736 = vrot.lane.b32.xlu1 %v1345_v0, %s1487_s11  ;;  %724 = vrot.lane.b32.xlu0 %v1339_v1, %s1487_s11 }
  0x8f   : > { %v1678_v6 = vpop.permute.xlu1 %408  ;;  %v563_v7 = vpop.permute.xlu0 %562 }
  0x90   : > { %v814_v23 = vsel %vm813_vm6, %v800_v22, %v563_v7  ;;  %v1347_v22 = vld [vmem:[%s1527_s21 + $0x6e] sm:$0xff] }
  0x91   : > { %376 = vrot.lane.b32.xlu1 %v1256_v4, %s1478_s23  ;;  %364 = vrot.lane.b32.xlu0 %v1250_v5, %s1478_s23 }
  0x93   : > { %v615_v11 = vpop.permute.xlu1 %614  ;;  %v1683_v12 = vpop.permute.xlu0 %420 }
  0x94   : > { %v828_v24 = vsel %vm827_vm7, %v814_v23, %v615_v11  ;;  %v1341_v23 = vld [vmem:[%s1527_s21 + $0x3e] sm:$0xff] }
  0x95   : > { %582 = vrot.lane.b32.xlu1 %v1319_v52, %s1482_s26  ;;  %570 = vrot.lane.b32.xlu0 %v1313_v53, %s1482_s26 }
  0x97   : > { %v1689_v15 = vpop.permute.xlu1 %472  ;;  %v1691_v16 = vpop.permute.xlu0 %460 }
  0x99   : > { %428 = vrot.lane.b32.xlu1 %v1281_v54, %s1480_s25  ;;  %416 = vrot.lane.b32.xlu0 %v1275_v55, %s1480_s25  ;;  %v765_v54 = vsel %vm757_vm2, %v215_v50, %v1670_v2  ;;  %v759_v55 = vsel %vm757_vm2, %v209_v51, %v1672_v3 }
  0x9a   : > { %v773_v56 = vsel %vm771_vm3, %v759_v55, %v1678_v6  ;;  %v779_v57 = vsel %vm771_vm3, %v765_v54, %v1683_v12  ;;  %v1283_v6 = vld [vmem:[%s1527_s21 + $0x6a] sm:$0xff] }
  0x9b   : > { %v1698_v20 = vpop.permute.xlu1 %512  ;;  %v667_v21 = vpop.permute.xlu0 %666  ;;  %v793_v60 = vsel %vm785_vm4, %v779_v57, %v1689_v15  ;;  %v787_v61 = vsel %vm785_vm4, %v773_v56, %v1691_v16  ;;  %v1334_v15 = vld [vmem:[%s1527_s21 + $0x6d] sm:$0xff]  ;;  %v1328_v16 = vld [vmem:[%s1527_s21 + $0x3d] sm:$0xff] }
  0x9c   : > { %v842_v28 = vsel %vm841_vm8, %v828_v24, %v667_v21  ;;  %v801_v0 = vsel %vm799_vm5, %v787_v61, %v1698_v20  ;;  %v1055_v57 = vld [vmem:[%s1857_s19] sm:$0xff] }
  0x9d   : > { %634 = vrot.lane.b32.xlu1 %v1320_v18, %s1485_s27  ;;  %622 = vrot.lane.b32.xlu0 %v1314_v19, %s1485_s27 }
  0x9f   : > { %v719_v29 = vpop.permute.xlu1 %718  ;;  %v525_v30 = vpop.permute.xlu0 %524 }
  0xa0   : > { %v856_v31 = vsel %vm855_vm9, %v842_v28, %v719_v29  ;;  %v807_v1 = vsel %vm799_vm5, %v793_v60, %v525_v30  ;;  %v1322_v29 = vld [vmem:[%s1527_s21 + $0x74] sm:$0xff]  ;;  %v1056_v60 = vld [vmem:[%s1857_s19 + $0x8] sm:$0xff] }
  0xa1   : > { %480 = vrot.lane.b32.xlu1 %v1282_v25, %s1477_s22  ;;  %468 = vrot.lane.b32.xlu0 %v1276_v27, %s1477_s22 }
  0xa2   : > { %1397 = vmatmul.mubr.msk.f32.vlgmr.msra.gmra.mrb[0].mxu0 %vm881_vm10, %v856_v31 }
  0xa3   : > { %v1714_v34 = vpop.permute.xlu1 %370  ;;  %v1716_v35 = vpop.permute.xlu0 %358  ;;  %1399 = vmatprep.mubr.msk.f32.mxu0 %vm1483_vm0, %v1484_v10 }
  0xa5   : > { %686 = vrot.lane.b32.xlu1 %v1333_v32, %s1486_s10  ;;  %674 = vrot.lane.b32.xlu0 %v1327_v33, %s1486_s10  ;;  %v216_v32 = vld [vmem:[%s1527_s21 + $0x40] sm:$0xff]  ;;  %v210_v33 = vld [vmem:[%s1527_s21 + $0x10] sm:$0xff] }
  0xa7   : > { %v577_v38 = vpop.permute.xlu1 %576  ;;  %v565_v39 = vpop.permute.xlu0 %564 }
  0xa8   : > { %v821_v2 = vsel %vm813_vm6, %v807_v1, %v577_v38  ;;  %v815_v3 = vsel %vm813_vm6, %v801_v0, %v565_v39  ;;  %v1057_v0 = vld [vmem:[%s1857_s19 + $0x10] sm:$0xff] }
  0xa9   : > { %532 = vrot.lane.b32.xlu1 %v1295_v36, %s1479_s24  ;;  %520 = vrot.lane.b32.xlu0 %v1289_v37, %s1479_s24  ;;  %v1335_v36 = vld [vmem:[%s1527_s21 + $0x75] sm:$0xff]  ;;  %v1329_v37 = vld [vmem:[%s1527_s21 + $0x45] sm:$0xff] }
  0xab   : > { %v1728_v42 = vpop.permute.xlu1 %422  ;;  %v1730_v43 = vpop.permute.xlu0 %410 }
  0xad   : > { %738 = vrot.lane.b32.xlu1 %v1346_v40, %s1487_s11  ;;  %726 = vrot.lane.b32.xlu0 %v1340_v41, %s1487_s11  ;;  %v766_v40 = vsel %vm757_vm2, %v216_v32, %v1714_v34  ;;  %v760_v41 = vsel %vm757_vm2, %v210_v33, %v1716_v35  ;;  %v1067_v32 = vld [vmem:[%s1857_s19 + $0x60] sm:$0xff]  ;;  %v1066_v33 = vld [vmem:[%s1857_s19 + $0x58] sm:$0xff] }
  0xaf   : > { %v629_v46 = vpop.permute.xlu1 %628  ;;  %v617_v47 = vpop.permute.xlu0 %616 }
  0xb0   : > { %v835_v4 = vsel %vm827_vm7, %v821_v2, %v629_v46  ;;  %v829_v5 = vsel %vm827_vm7, %v815_v3, %v617_v47  ;;  %v1342_v46 = vld [vmem:[%s1527_s21 + $0x46] sm:$0xff] }
  0xb1   : > { %378 = vrot.lane.b32.xlu1 %v1257_v44, %s1478_s23  ;;  %366 = vrot.lane.b32.xlu0 %v1251_v45, %s1478_s23  ;;  %v774_v44 = vsel %vm771_vm3, %v760_v41, %v1730_v43  ;;  %v1348_v45 = vld [vmem:[%s1527_s21 + $0x76] sm:$0xff]  ;;  %v1060_v3 = vld [vmem:[%s1857_s19 + $0x28] sm:$0xff] }
  0xb3   : > { %v1738_v48 = vpop.permute.xlu1 %474  ;;  %v1740_v49 = vpop.permute.xlu0 %462 }
  0xb4   : > { %v788_v34 = vsel %vm785_vm4, %v774_v44, %v1740_v49 }
  0xb5   : > { %584 = vrot.lane.b32.xlu1 %v1320_v18, %s1482_s26  ;;  %572 = vrot.lane.b32.xlu0 %v1314_v19, %s1482_s26  ;;  %v1290_v19 = vld [vmem:[%s1527_s21 + $0x3b] sm:$0xff] }
  0xb7   : > { %v681_v52 = vpop.permute.xlu1 %680  ;;  %v669_v53 = vpop.permute.xlu0 %668 }
  0xb8   : > { %v849_v7 = vsel %vm841_vm8, %v835_v4, %v681_v52  ;;  %v843_v8 = vsel %vm841_vm8, %v829_v5, %v669_v53  ;;  %v1059_v4 = vld [vmem:[%s1857_s19 + $0x20] sm:$0xff] }
  0xb9   : > { %430 = vrot.lane.b32.xlu1 %v1282_v25, %s1480_s25  ;;  %418 = vrot.lane.b32.xlu0 %v1276_v27, %s1480_s25 }
  0xbb   : > { %v1762_v62 = vpop.permute.xlu1 %526  ;;  %v1764_v63 = vpop.permute.xlu0 %514 }
  0xbd   : > { %636 = vrot.lane.b32.xlu1 %v1321_v58, %s1485_s27  ;;  %624 = vrot.lane.b32.xlu0 %v1315_v59, %s1485_s27 }
  0xbf   : > { %v733_v11 = vpop.permute.xlu1 %732  ;;  %v721_v12 = vpop.permute.xlu0 %720 }
  0xc0   : > { %v863_v13 = vsel %vm855_vm9, %v849_v7, %v733_v11  ;;  %v857_v14 = vsel %vm855_vm9, %v843_v8, %v721_v12  ;;  %v1062_v7 = vld [vmem:[%s1857_s19 + $0x38] sm:$0xff]  ;;  %v1061_v8 = vld [vmem:[%s1857_s19 + $0x30] sm:$0xff] }
  0xc1   : > { %482 = vrot.lane.b32.xlu1 %v1283_v6, %s1477_s22  ;;  %470 = vrot.lane.b32.xlu0 %v1546_v9, %s1477_s22  ;;  %v1296_v9 = vld [vmem:[%s1527_s21 + $0x6b] sm:$0xff] }
  0xc2   : > { %1400 = vmatmul.mubr.msk.f32.gmra.mrb[2].mxu0 %vm881_vm10, %v857_v14  ;;  %1418 = vmatmul.mubr.msk.f32.vlgmr.msra.gmra.mrb[0].mxu1 %vm881_vm10, %v863_v13  ;;  %v1064_v13 = vld [vmem:[%s1857_s19 + $0x48] sm:$0xff]  ;;  %v1063_v14 = vld [vmem:[%s1857_s19 + $0x40] sm:$0xff] }
  0xc3   : > { %v1787_v17 = vpop.permute.xlu1 %372  ;;  %v1789_v18 = vpop.permute.xlu0 %360  ;;  %1402 = vmatprep.mubr.msk.f32.mxu0 %vm1483_vm0, %v1484_v10  ;;  %1420 = vmatprep.mubr.msk.f32.mxu1 %vm1483_vm0, %v1484_v10 }
  0xc5   : > { %688 = vrot.lane.b32.xlu1 %v1334_v15, %s1486_s10  ;;  %676 = vrot.lane.b32.xlu0 %v1328_v16, %s1486_s10 }
  0xc7   : > { %v579_v20 = vpop.permute.xlu1 %578  ;;  %v567_v21 = vpop.permute.xlu0 %566 }
  0xc9   : > { %534 = vrot.lane.b32.xlu1 %v1296_v9, %s1479_s24  ;;  %522 = vrot.lane.b32.xlu0 %v1290_v19, %s1479_s24  ;;  %v217_v9 = vld [vmem:[%s1527_s21 + $0x48] sm:$0xff]  ;;  %v211_v19 = vld [vmem:[%s1527_s21 + $0x18] sm:$0xff]  ;;  %s2011_s24 = scalar_lea.vmem %s2058_s4, %s1237_s16 }
  0xcb   : > { %v1803_v24 = vpop.permute.xlu1 %424  ;;  %v1805_v25 = vpop.permute.xlu0 %412 }
  0xcd   : > { %740 = vrot.lane.b32.xlu1 %v1347_v22, %s1487_s11  ;;  %728 = vrot.lane.b32.xlu0 %v1341_v23, %s1487_s11  ;;  %v1065_v22 = vld [vmem:[%s1857_s19 + $0x50] sm:$0xff]  ;;  %v767_v23 = vsel %vm757_vm2, %v217_v9, %v1787_v17 }
  0xcf   : > { %v631_v27 = vpop.permute.xlu1 %630  ;;  %v619_v28 = vpop.permute.xlu0 %618 }
  0xd1   : > { %586 = vrot.lane.b32.xlu1 %v1321_v58, %s1482_s26  ;;  %574 = vrot.lane.b32.xlu0 %v1315_v59, %s1482_s26 }
  0xd3   : > { %v1814_v30 = vpop.permute.xlu1 %476  ;;  %v1816_v31 = vpop.permute.xlu0 %464 }
  0xd5   : > { %638 = vrot.lane.b32.xlu1 %v1322_v29, %s1485_s27  ;;  %626 = vrot.lane.b32.xlu0 %v1589_v26, %s1485_s27  ;;  %v780_v26 = vsel %vm771_vm3, %v766_v40, %v1728_v42  ;;  %v802_v42 = vsel %vm799_vm5, %v788_v34, %v1764_v63  ;;  %v1058_v63 = vld [vmem:[%s1857_s19 + $0x18] sm:$0xff] }
  0xd6   : > { %v794_v47 = vsel %vm785_vm4, %v780_v26, %v1738_v48  ;;  %v816_v48 = vsel %vm813_vm6, %v802_v42, %v567_v21 }
  0xd7   : > { %v683_v38 = vpop.permute.xlu1 %682  ;;  %v671_v39 = vpop.permute.xlu0 %670  ;;  %v808_v51 = vsel %vm799_vm5, %v794_v47, %v1762_v62  ;;  %v830_v52 = vsel %vm827_vm7, %v816_v48, %v619_v28  ;;  %v781_v28 = vsel %vm771_vm3, %v767_v23, %v1803_v24 }
  0xd8   : > { %v822_v43 = vsel %vm813_vm6, %v808_v51, %v579_v20  ;;  %v844_v54 = vsel %vm841_vm8, %v830_v52, %v671_v39 }
  0xd9   : > { %690 = vrot.lane.b32.xlu1 %v1335_v36, %s1486_s10  ;;  %678 = vrot.lane.b32.xlu0 %v1329_v37, %s1486_s10  ;;  %v836_v49 = vsel %vm827_vm7, %v822_v43, %v631_v27  ;;  %v761_v27 = vsel %vm757_vm2, %v211_v19, %v1789_v18  ;;  %v795_v36 = vsel %vm785_vm4, %v781_v28, %v1814_v30 }
  0xda   : > { %v850_v53 = vsel %vm841_vm8, %v836_v49, %v683_v38  ;;  %v775_v29 = vsel %vm771_vm3, %v761_v27, %v1805_v25 }
  0xdb   : > { %v1844_v35 = vpop.permute.xlu1 %528  ;;  %v1846_v50 = vpop.permute.xlu0 %516  ;;  %v789_v37 = vsel %vm785_vm4, %v775_v29, %v1816_v31  ;;  %v219_v29 = vld [vmem:[%s1527_s21 + $0x58] sm:$0xff] }
  0xdc   : > { %v809_v17 = vsel %vm799_vm5, %v795_v36, %v1844_v35  ;;  %v803_v18 = vsel %vm799_vm5, %v789_v37, %v1846_v50 }
  0xdd   : > { %742 = vrot.lane.b32.xlu1 %v1348_v45, %s1487_s11  ;;  %730 = vrot.lane.b32.xlu0 %v1342_v46, %s1487_s11 }
  0xdf   : > { %v735_v55 = vpop.permute.xlu1 %734  ;;  %v723_v56 = vpop.permute.xlu0 %722 }
  0xe0   : > { %v864_v58 = vsel %vm855_vm9, %v850_v53, %v735_v55  ;;  %v858_v59 = vsel %vm855_vm9, %v844_v54, %v723_v56  ;;  %v218_v53 = vld [vmem:[%s1527_s21 + $0x50] sm:$0xff]  ;;  %v212_v54 = vld [vmem:[%s1527_s21 + $0x20] sm:$0xff] }
  0xe1   : > { %1403 = vmatmul.mubr.msk.f32.gmra.mrb[4].mxu0 %vm881_vm10, %v858_v59  ;;  %1421 = vmatmul.mubr.msk.f32.gmra.mrb[2].mxu1 %vm881_vm10, %v864_v58 }
  0xe2   : > { %1070 = vperm.xlu0 %1467, %v1055_v57   ;;  %1405 = vmatprep.mubr.msk.f32.mxu0 %vm1483_vm0, %v1484_v10 }
  0xe3   : > { %v1875_v61 = vpop.permute.xlu1 %374  ;;  %v1877_v62 = vpop.permute.xlu0 %362  ;;  %1423 = vmatprep.mubr.msk.f32.mxu1 %vm1483_vm0, %v1484_v10  ;;  %1075 = vperm.xlu1 %1468, %v1056_v60  }
  0xe4   : > { %v768_v57 = vsel %vm757_vm2, %v218_v53, %v1875_v61  ;;  %v762_v58 = vsel %vm757_vm2, %v212_v54, %v1877_v62 }
  0xe6   : > { %1085 = vperm.xlu0 %1467, %v1058_v63  }
  0xe7   : > { %v581_v1 = vpop.permute.xlu1 %580  ;;  %v569_v2 = vpop.permute.xlu0 %568  ;;  %1080 = vperm.xlu1 %1468, %v1057_v0  }
  0xe8   : > { %v823_v24 = vsel %vm813_vm6, %v809_v17, %v581_v1  ;;  %v817_v25 = vsel %vm813_vm6, %v803_v18, %v569_v2 }
  0xea   : > { %1095 = vperm.xlu0 %1467, %v1060_v3  }
  0xeb   : > { %v1885_v5 = vpop.permute.xlu1 %426  ;;  %v1887_v6 = vpop.permute.xlu0 %414  ;;  %1090 = vperm.xlu1 %1468, %v1059_v4  }
  0xec   : > { %v782_v59 = vsel %vm771_vm3, %v768_v57, %v1885_v5  ;;  %v776_v60 = vsel %vm771_vm3, %v762_v58, %v1887_v6 }
  0xee   : > { %1105 = vperm.xlu0 %1467, %v1062_v7  }
  0xef   : > { %v633_v11 = vpop.permute.xlu1 %632  ;;  %v621_v12 = vpop.permute.xlu0 %620  ;;  %1100 = vperm.xlu1 %1468, %v1061_v8  }
  0xf0   : > { %v837_v40 = vsel %vm827_vm7, %v823_v24, %v633_v11  ;;  %v831_v30 = vsel %vm827_vm7, %v817_v25, %v621_v12 }
  0xf2   : > { %1115 = vperm.xlu0 %1467, %v1064_v13  }
  0xf3   : > { %v479_v15 = vpop.permute.xlu1 %478  ;;  %v467_v16 = vpop.permute.xlu0 %466  ;;  %1110 = vperm.xlu1 %1468, %v1063_v14  }
  0xf4   : > { %v796_v63 = vsel %vm785_vm4, %v782_v59, %v479_v15  ;;  %v790_v0 = vsel %vm785_vm4, %v776_v60, %v467_v16 }
  0xf6   : > { %1125 = vperm.xlu0 %1467, %v1066_v33  }
  0xf7   : > { %v685_v20 = vpop.permute.xlu1 %684  ;;  %v673_v21 = vpop.permute.xlu0 %672  ;;  %1120 = vperm.xlu1 %1468, %v1065_v22  }
  0xf8   : > { %v851_v31 = vsel %vm841_vm8, %v837_v40, %v685_v20  ;;  %v845_v41 = vsel %vm841_vm8, %v831_v30, %v673_v21 }
  0xfb   : > { %v531_v38 = vpop.permute.xlu1 %530  ;;  %v519_v39 = vpop.permute.xlu0 %518  ;;  %1130 = vperm.xlu1 %1468, %v1067_v32   ;;  %v213_v32 = vld [vmem:[%s1527_s21 + $0x28] sm:$0xff] }
  0xfc   : > { %v810_v3 = vsel %vm799_vm5, %v796_v63, %v531_v38  ;;  %v804_v4 = vsel %vm799_vm5, %v790_v0, %v519_v39 }
  0xff   : > { %v737_v26 = vpop.permute.xlu1 %736  ;;  %v725_v44 = vpop.permute.xlu0 %724 }
 0x100   : > { %v865_v45 = vsel %vm855_vm9, %v851_v31, %v737_v26  ;;  %v859_v46 = vsel %vm855_vm9, %v845_v41, %v725_v44 }
 0x101   : > { %1406 = vmatmul.mubr.msk.f32.gmra.mrb[6].mxu0 %vm881_vm10, %v859_v46  ;;  %1424 = vmatmul.mubr.msk.f32.gmra.mrb[4].mxu1 %vm881_vm10, %v865_v45 }
 0x102   : > { %1408 = vmatprep.mubr.msk.f32.mxu0 %vm1483_vm0, %v1484_v10  ;;  %1426 = vmatprep.mubr.msk.f32.mxu1 %vm1483_vm0, %v1484_v10 }
 0x103   : > { %v377_v47 = vpop.permute.xlu1 %376  ;;  %v365_v34 = vpop.permute.xlu0 %364 }
 0x104   : > { %v769_v37 = vsel %vm757_vm2, %v219_v29, %v377_v47  ;;  %v763_v38 = vsel %vm757_vm2, %v213_v32, %v365_v34 }
 0x107   : > { %v583_v35 = vpop.permute.xlu1 %582  ;;  %v571_v50 = vpop.permute.xlu0 %570 }
 0x108   : > { %v824_v61 = vsel %vm813_vm6, %v810_v3, %v583_v35  ;;  %v818_v62 = vsel %vm813_vm6, %v804_v4, %v571_v50 }
 0x10b   : > { %v429_v51 = vpop.permute.xlu1 %428  ;;  %v417_v42 = vpop.permute.xlu0 %416 }
 0x10c   : > { %v783_v39 = vsel %vm771_vm3, %v769_v37, %v429_v51  ;;  %v777_v17 = vsel %vm771_vm3, %v763_v38, %v417_v42 }
 0x10f   : > { %v635_v43 = vpop.permute.xlu1 %634  ;;  %v623_v48 = vpop.permute.xlu0 %622 }
 0x110   : > { %v838_v7 = vsel %vm827_vm7, %v824_v61, %v635_v43  ;;  %v832_v5 = vsel %vm827_vm7, %v818_v62, %v623_v48  ;;  %v220_v48 = vld [vmem:[%s1527_s21 + $0x60] sm:$0xff] }
 0x113   : > { %v481_v49 = vpop.permute.xlu1 %480  ;;  %v469_v52 = vpop.permute.xlu0 %468 }
 0x114   : > { %v797_v18 = vsel %vm785_vm4, %v783_v39, %v481_v49  ;;  %v791_v24 = vsel %vm785_vm4, %v777_v17, %v469_v52  ;;  %v214_v49 = vld [vmem:[%s1527_s21 + $0x30] sm:$0xff] }
 0x117   : > { %v687_v55 = vpop.permute.xlu1 %686  ;;  %v675_v56 = vpop.permute.xlu0 %674 }
 0x118   : > { %v852_v6 = vsel %vm841_vm8, %v838_v7, %v687_v55  ;;  %v846_v8 = vsel %vm841_vm8, %v832_v5, %v675_v56 }
 0x11b   : > { %v533_v1 = vpop.permute.xlu1 %532  ;;  %v521_v2 = vpop.permute.xlu0 %520 }
 0x11c   : > { %v811_v30 = vsel %vm799_vm5, %v797_v18, %v533_v1  ;;  %v805_v31 = vsel %vm799_vm5, %v791_v24, %v521_v2 }
 0x11f   : > { %v739_v11 = vpop.permute.xlu1 %738  ;;  %v727_v12 = vpop.permute.xlu0 %726 }
 0x120   : > { %v866_v13 = vsel %vm855_vm9, %v852_v6, %v739_v11  ;;  %v860_v14 = vsel %vm855_vm9, %v846_v8, %v727_v12  ;;  %v2003_v11 = vld [vmem:[%s2056_s2] ss:$0 sm:$0xff] }
 0x121   : > { %1409 = vmatmul.mubr.msk.f32.gmra.mrb[8].mxu0 %vm881_vm10, %v860_v14  ;;  %1427 = vmatmul.mubr.msk.f32.gmra.mrb[6].mxu1 %vm881_vm10, %v866_v13 }
 0x122   : > { %1411 = vmatprep.mubr.msk.f32.mxu0 %vm1483_vm0, %v1484_v10  ;;  %1429 = vmatprep.mubr.msk.f32.mxu1 %vm1483_vm0, %v1484_v10 }
 0x123   : > { %v379_v15 = vpop.permute.xlu1 %378  ;;  %v367_v16 = vpop.permute.xlu0 %366 }
 0x124   : > { %v770_v54 = vsel %vm757_vm2, %v220_v48, %v379_v15  ;;  %v764_v55 = vsel %vm757_vm2, %v214_v49, %v367_v16 }
 0x127   : > { %v585_v9 = vpop.permute.xlu1 %584  ;;  %v573_v19 = vpop.permute.xlu0 %572 }
 0x128   : > { %v825_v41 = vsel %vm813_vm6, %v811_v30, %v585_v9  ;;  %v819_v26 = vsel %vm813_vm6, %v805_v31, %v573_v19 }
 0x12b   : > { %v431_v20 = vpop.permute.xlu1 %430  ;;  %v419_v21 = vpop.permute.xlu0 %418 }
 0x12c   : > { %v784_v56 = vsel %vm771_vm3, %v770_v54, %v431_v20  ;;  %v778_v57 = vsel %vm771_vm3, %v764_v55, %v419_v21 }
 0x12f   : > { %v637_v22 = vpop.permute.xlu1 %636  ;;  %v625_v23 = vpop.permute.xlu0 %624 }
 0x130   : > { %v839_v44 = vsel %vm827_vm7, %v825_v41, %v637_v22  ;;  %v833_v45 = vsel %vm827_vm7, %v819_v26, %v625_v23 }
 0x133   : > { %v483_v27 = vpop.permute.xlu1 %482  ;;  %v471_v28 = vpop.permute.xlu0 %470 }
 0x134   : > { %v798_v58 = vsel %vm785_vm4, %v784_v56, %v483_v27  ;;  %v792_v59 = vsel %vm785_vm4, %v778_v57, %v471_v28 }
 0x137   : > { %v689_v33 = vpop.permute.xlu1 %688  ;;  %v677_v36 = vpop.permute.xlu0 %676 }
 0x138   : > { %v853_v46 = vsel %vm841_vm8, %v839_v44, %v689_v33  ;;  %v847_v47 = vsel %vm841_vm8, %v833_v45, %v677_v36 }
 0x13b   : > { %v535_v25 = vpop.permute.xlu1 %534  ;;  %v523_v40 = vpop.permute.xlu0 %522 }
 0x13c   : > { %v812_v63 = vsel %vm799_vm5, %v798_v58, %v535_v25  ;;  %v806_v0 = vsel %vm799_vm5, %v792_v59, %v523_v40 }
 0x13f   : > { %v741_v34 = vpop.permute.xlu1 %740  ;;  %v729_v35 = vpop.permute.xlu0 %728 }
 0x140   : > { %v867_v50 = vsel %vm855_vm9, %v853_v46, %v741_v34  ;;  %v861_v51 = vsel %vm855_vm9, %v847_v47, %v729_v35 }
 0x141   : > { %1412 = vmatmul.mubr.msk.f32.gmra.mrb[10].mxu0 %vm881_vm10, %v861_v51  ;;  %1430 = vmatmul.mubr.msk.f32.gmra.mrb[8].mxu1 %vm881_vm10, %v867_v50 }
 0x142   : > { %1414 = vmatprep.mubr.msk.f32.mxu0 %vm1483_vm0, %v1484_v10  ;;  %1432 = vmatprep.mubr.msk.f32.mxu1 %vm1483_vm0, %v1484_v10 }
 0x143   : > { %v587_v42 = vpop.permute.xlu1 %586  ;;  %v575_v43 = vpop.permute.xlu0 %574 }
 0x144   : > { %v826_v1 = vsel %vm813_vm6, %v812_v63, %v587_v42  ;;  %v820_v2 = vsel %vm813_vm6, %v806_v0, %v575_v43 }
 0x147   : > { %v639_v52 = vpop.permute.xlu1 %638  ;;  %v627_v53 = vpop.permute.xlu0 %626 }
 0x148   : > { %v840_v3 = vsel %vm827_vm7, %v826_v1, %v639_v52  ;;  %v834_v4 = vsel %vm827_vm7, %v820_v2, %v627_v53 }
 0x14b   : > { %v691_v60 = vpop.permute.xlu1 %690  ;;  %v679_v10 = vpop.permute.xlu0 %678 }
 0x14c   : > { %v854_v61 = vsel %vm841_vm8, %v840_v3, %v691_v60  ;;  %v848_v62 = vsel %vm841_vm8, %v834_v4, %v679_v10 }
 0x14f   : > { %v743_v7 = vpop.permute.xlu1 %742  ;;  %v731_v5 = vpop.permute.xlu0 %730 }
 0x150   : > { %v868_v6 = vsel %vm855_vm9, %v854_v61, %v743_v7  ;;  %v862_v8 = vsel %vm855_vm9, %v848_v62, %v731_v5 }
 0x151   : > { %1415 = vmatmul.mubr.msk.f32.gmra.mrb[12].mxu0 %vm881_vm10, %v862_v8  ;;  %1433 = vmatmul.mubr.msk.f32.gmra.mrb[10].mxu1 %vm881_vm10, %v868_v6 }
 0x161   : > { %v1071_v13 = vpop.permute.xlu0 %1070 }
 0x162   : > { %v1076_v20 = vpop.permute.xlu1 %1075 }
 0x165   : > { %v1086_v9 = vpop.permute.xlu0 %1085 }
 0x166   : > { %v1081_v37 = vpop.permute.xlu1 %1080 }
 0x169   : > { %v1096_v19 = vpop.permute.xlu0 %1095 }
 0x16a   : > { %v1091_v38 = vpop.permute.xlu1 %1090 }
 0x16d   : > { %v1106_v21 = vpop.permute.xlu0 %1105 }
 0x16e   : > { %v1101_v39 = vpop.permute.xlu1 %1100 }
 0x171   : > { %v1116_v44 = vpop.permute.xlu0 %1115 }
 0x172   : > { %v1111_v17 = vpop.permute.xlu1 %1110 }
 0x175   : > { %v991_v12 = vpop.f32.mrb[0].mxu0  ;;  %v1126_v1 = vpop.permute.xlu0 %1125 }
 0x176   : > { %v992_v14 = vadd.f32 %v2003_v11, %v991_v12  ;;  %v1398_v15 = vpop.f32.mrb[1].mxu0  ;;  %v1121_v43 = vpop.permute.xlu1 %1120 }
 0x178   : > { %v1133_v16 = vmul.f32 %v1071_v13, %v992_v14 }
 0x17a   : > { %1146 = vst.msk [vmem:[%s2011_s24] sm:$0xff] %vm855_vm9, %v1133_v16  ;;  %v1131_v8 = vpop.permute.xlu1 %1130 }
 0x195   : > { %v996_v22 = vpop.f32.mrb[2].mxu0  ;;  %v1026_v23 = vpop.f32.mrb[0].mxu1 }
 0x196   : > { %v997_v27 = vadd.f32 %v2003_v11, %v996_v22  ;;  %v1027_v28 = vadd.f32 %v2003_v11, %v1026_v23  ;;  %v1401_v29 = vpop.f32.mrb[3].mxu0  ;;  %v1419_v32 = vpop.f32.mrb[1].mxu1 }
 0x198   : > { %v1134_v33 = vmul.f32 %v1076_v20, %v997_v27  ;;  %v1140_v36 = vmul.f32 %v1106_v21, %v1027_v28 }
 0x19a   : > { %1147 = vst.msk [vmem:[%s2011_s24 + $0x8] sm:$0xff] %vm855_vm9, %v1134_v33  ;;  %1153 = vst.msk [vmem:[%s2011_s24 + $0x38] sm:$0xff] %vm855_vm9, %v1140_v36 }
 0x1b4   : > { %v1001_v18 = vpop.f32.mrb[4].mxu0  ;;  %v1031_v24 = vpop.f32.mrb[2].mxu1 }
 0x1b5   : > { %v1002_v25 = vadd.f32 %v2003_v11, %v1001_v18  ;;  %v1032_v40 = vadd.f32 %v2003_v11, %v1031_v24  ;;  %v1404_v30 = vpop.f32.mrb[5].mxu0  ;;  %v1422_v31 = vpop.f32.mrb[3].mxu1 }
 0x1b7   : > { %v1135_v41 = vmul.f32 %v1081_v37, %v1002_v25  ;;  %v1141_v26 = vmul.f32 %v1111_v17, %v1032_v40 }
 0x1b9   : > { %1148 = vst.msk [vmem:[%s2011_s24 + $0x10] sm:$0xff] %vm855_vm9, %v1135_v41  ;;  %1154 = vst.msk [vmem:[%s2011_s24 + $0x40] sm:$0xff] %vm855_vm9, %v1141_v26 }
 0x1d4   : > { %v1006_v45 = vpop.f32.mrb[6].mxu0  ;;  %v1036_v46 = vpop.f32.mrb[4].mxu1 }
 0x1d5   : > { %v1007_v47 = vadd.f32 %v2003_v11, %v1006_v45  ;;  %v1037_v34 = vadd.f32 %v2003_v11, %v1036_v46  ;;  %v1407_v35 = vpop.f32.mrb[7].mxu0  ;;  %v1425_v50 = vpop.f32.mrb[5].mxu1 }
 0x1d7   : > { %v1136_v51 = vmul.f32 %v1086_v9, %v1007_v47  ;;  %v1142_v42 = vmul.f32 %v1116_v44, %v1037_v34 }
 0x1d9   : > { %1149 = vst.msk [vmem:[%s2011_s24 + $0x18] sm:$0xff] %vm855_vm9, %v1136_v51  ;;  %1155 = vst.msk [vmem:[%s2011_s24 + $0x48] sm:$0xff] %vm855_vm9, %v1142_v42 }
 0x1f4   : > { %v1011_v48 = vpop.f32.mrb[8].mxu0  ;;  %v1041_v49 = vpop.f32.mrb[6].mxu1 }
 0x1f5   : > { %v1012_v52 = vadd.f32 %v2003_v11, %v1011_v48  ;;  %v1042_v53 = vadd.f32 %v2003_v11, %v1041_v49  ;;  %v1410_v54 = vpop.f32.mrb[9].mxu0  ;;  %v1428_v55 = vpop.f32.mrb[7].mxu1 }
 0x1f7   : > { %v1137_v56 = vmul.f32 %v1091_v38, %v1012_v52  ;;  %v1143_v57 = vmul.f32 %v1121_v43, %v1042_v53 }
 0x1f9   : > { %1150 = vst.msk [vmem:[%s2011_s24 + $0x20] sm:$0xff] %vm855_vm9, %v1137_v56  ;;  %1156 = vst.msk [vmem:[%s2011_s24 + $0x50] sm:$0xff] %vm855_vm9, %v1143_v57 }
 0x214   : > { %v1016_v58 = vpop.f32.mrb[10].mxu0  ;;  %v1046_v59 = vpop.f32.mrb[8].mxu1 }
 0x215   : > { %v1017_v60 = vadd.f32 %v2003_v11, %v1016_v58  ;;  %v1047_v10 = vadd.f32 %v2003_v11, %v1046_v59  ;;  %v1413_v63 = vpop.f32.mrb[11].mxu0  ;;  %v1431_v0 = vpop.f32.mrb[9].mxu1 }
 0x217   : > { %v1138_v2 = vmul.f32 %v1096_v19, %v1017_v60  ;;  %v1144_v3 = vmul.f32 %v1126_v1, %v1047_v10 }
 0x219   : > { %1151 = vst.msk [vmem:[%s2011_s24 + $0x28] sm:$0xff] %vm855_vm9, %v1138_v2  ;;  %1157 = vst.msk [vmem:[%s2011_s24 + $0x58] sm:$0xff] %vm855_vm9, %v1144_v3 }
 0x224   : > { %v1021_v4 = vpop.f32.mrb[12].mxu0  ;;  %v1051_v61 = vpop.f32.mrb[10].mxu1 }
 0x225   : > { %v1022_v62 = vadd.f32 %v2003_v11, %v1021_v4  ;;  %v1052_v7 = vadd.f32 %v2003_v11, %v1051_v61  ;;  %v1416_v5 = vpop.f32.mrb[13].mxu0  ;;  %v1434_v6 = vpop.f32.mrb[11].mxu1 }
 0x227   : > { %v1139_v12 = vmul.f32 %v1101_v39, %v1022_v62  ;;  %v1145_v13 = vmul.f32 %v1131_v8, %v1052_v7 }
 0x229   : > { %1152 = vst.msk [vmem:[%s2011_s24 + $0x30] sm:$0xff] %vm855_vm9, %v1139_v12  ;;  %1158 = vst.msk [vmem:[%s2011_s24 + $0x60] sm:$0xff] %vm855_vm9, %v1145_v13 }
 0x22a PF: > { %s14_s15 = sadd.s32 1, %s1475_s15  }
 0x22b   : > { %p11_p6 = scmp.ge.s32.totalorder %s14_s15, 7  }
 0x22d   :  { %13 = sbr.rel (!%p11_p6) target bundleno = 1 (0x1), region = 75 }

</bundles_post_ra>
